<compile_context>
chip_gen: v7x
topology: tpu7x:2x2x1
jax: 0.10.0
libtpu: 0.0.40
codegen_flags: <defaults>
</compile_context>

<pallas_src>
import functools

import numpy as np
import jax
import jax.numpy as jnp
from jax import lax
from jax.experimental import pallas as pl
from jax.experimental.pallas import tpu as pltpu

BN_EPS = 1e-5


def _round_up(x, m):
    return ((x + m - 1) // m) * m


def _sa_kernel(W, C, L, w_ref, shift_ref, x1_ref, x2_ref, out_ref):
    # w_ref:     SMEM (18,) conv weights with BN scale folded in, layout [c, ky, kx]
    # shift_ref: SMEM (1,)  folded BN shift
    # x1/x2/out: VMEM, either (nb, C*L) lane-dense or (nb, C, L) fallback layout
    nb = x1_ref.shape[0]
    flat = len(x1_ref.shape) == 2
    pad = _round_up(W + 1, 128)          # zero border >= max |dy*W + dx|, 128-aligned

    def read_c(ref, c):                  # (nb, L) lane-aligned channel slice
        return ref[:, c * L:(c + 1) * L] if flat else ref[:, c, :]

    # Channel-wise max of x1 / mean of x2, accumulated in f32 over per-channel
    # slices (never materializes a full (nb, C, L) value).
    ch_max = read_c(x1_ref, 0).astype(jnp.float32)
    ch_sum = read_c(x2_ref, 0).astype(jnp.float32)
    for c in range(1, C):
        ch_max = jnp.maximum(ch_max, read_c(x1_ref, c).astype(jnp.float32))
        ch_sum = ch_sum + read_c(x2_ref, c).astype(jnp.float32)
    ch_mean = ch_sum * (1.0 / C)

    # Zero-bordered flat maps as in-register values (no VMEM scratch / memset);
    # the concat pieces are 128-lane aligned.
    z = jnp.zeros((nb, pad), jnp.float32)
    pmax = jnp.concatenate([z, ch_max, z], axis=1)
    pmean = jnp.concatenate([z, ch_mean, z], axis=1)

    # 3x3 conv (cross-correlation, 2->1 ch, pad=1, stride=1, no bias) in the
    # flattened layout: shifted read at offset s = dy*W + dx; the zero border
    # handles top/bottom rows, the per-dx column mask fixes row wrap-around.
    col = lax.broadcasted_iota(jnp.int32, (nb, L), 1) % W
    m_left = col >= 1                    # valid when dx == -1
    m_right = col <= W - 2               # valid when dx == +1

    w = [w_ref[i] for i in range(18)]    # hoisted scalar SMEM reads

    acc = jnp.zeros((nb, L), jnp.float32)
    for dx, cmask in ((-1, m_left), (0, None), (1, m_right)):
        part = jnp.zeros((nb, L), jnp.float32)
        for dy in (-1, 0, 1):
            s = dy * W + dx
            ki = (dy + 1) * 3 + (dx + 1)
            part = part + w[ki] * pmax[:, pad + s:pad + s + L]
            part = part + w[9 + ki] * pmean[:, pad + s:pad + s + L]
        if cmask is not None:
            part = jnp.where(cmask, part, 0.0)
        acc = acc + part

    # Folded BN shift, then sigmoid: exp on the EUP + approx reciprocal (EUP slot).
    bn = acc + shift_ref[0]
    scale = pl.reciprocal(1.0 + jnp.exp(-bn), approx=True)
    scale_o = scale.astype(out_ref.dtype)      # bf16 inputs: gate stays in bf16

    # Spatially gate x2 channel by channel (lane-dense stores; x2 re-read from
    # the resident VMEM tile instead of keeping it live across the conv).
    for c in range(C):
        val = read_c(x2_ref, c) * scale_o
        if flat:
            out_ref[:, c * L:(c + 1) * L] = val
        else:
            out_ref[:, c, :] = val


def sa_layer(x1, x2, conv_w, bn_gamma, bn_beta, bn_mean, bn_var, *, block_n=None):
    """x1, x2: (N, C, H, W).  conv_w: (1, 2, 3, 3).  BN params: scalars or (1,)."""
    N, C, H, W = x1.shape
    L = H * W
    CL = C * L

    # Fold eval-mode BatchNorm into the conv weights + a single scalar shift.
    bn_scale = (jnp.asarray(bn_gamma, jnp.float32) /
                jnp.sqrt(jnp.asarray(bn_var, jnp.float32) + BN_EPS))
    bn_shift = jnp.asarray(bn_beta, jnp.float32) - jnp.asarray(bn_mean, jnp.float32) * bn_scale
    w_folded = (conv_w.astype(jnp.float32) * bn_scale).reshape(-1)      # (18,) [c,ky,kx]
    shift = jnp.reshape(bn_shift, (-1,))[:1]                            # (1,)

    # --- Generation-aware sizing -------------------------------------------
    itemsize = int(np.dtype(x1.dtype).itemsize)
    sub = max(8, 32 // itemsize)          # sublane tile: 8 f32, 16 bf16, 32 int8
    try:
        kind = jax.devices()[0].device_kind.lower()
    except Exception:
        kind = ""
    is_v7 = ("v7" in kind) or ("7x" in kind)
    num_cores = 2 if is_v7 else 1
    try:
        vmem_cap = int(getattr(pltpu.get_tpu_info(), "vmem_capacity_bytes"))
    except Exception:
        vmem_cap = (64 << 20) if is_v7 else (128 << 20)
    if is_v7:
        tile_target = 4 << 20             # 3.2 TB/s HBM: keep >=2 steps per TC
    elif "v5" in kind:
        tile_target = 3 << 20             # ~820 GB/s: per-step overhead already small
    else:
        tile_target = 8 << 20             # v6e: 1 TC, 128 MiB VMEM -> big tiles

    per_sample = CL * itemsize
    if block_n is None:
        nb_budget = max(1, tile_target // per_sample)
        min_steps = 2 * num_cores         # pipelining overlap (+ both TCs on v7x)
        soft_cap = max(1, N // min_steps)
        bn_ = max(1, min(N, nb_budget, soft_cap))
        if bn_ >= sub:
            bn_ = (bn_ // sub) * sub      # keep 2-D lane-dense layout legal & dense
        elif nb_budget >= N:
            bn_ = N                       # small batch that fits: whole-batch block
        block_n = int(bn_)
    block_n = int(min(max(1, block_n), N))
    use_flat = (block_n == N) or (block_n % sub == 0)
    grid_n = pl.cdiv(N, block_n)

    # --- Layout & BlockSpecs ------------------------------------------------
    if use_flat:
        # 2-D lane-dense layout: last dim C*L (full array dim), batch blocked.
        x1v, x2v = x1.reshape(N, CL), x2.reshape(N, CL)
        blk, idx = (block_n, CL), (lambda n: (n, 0))
        out_struct = jax.ShapeDtypeStruct((N, CL), x2.dtype)
        padded_tile = _round_up(block_n, sub) * _round_up(CL, 128) * itemsize
    else:
        # Fallback: per-sample blocking with (C, L) as the (full-dim) tiled dims.
        x1v, x2v = x1.reshape(N, C, L), x2.reshape(N, C, L)
        blk, idx = (block_n, C, L), (lambda n: (n, 0, 0))
        out_struct = jax.ShapeDtypeStruct((N, C, L), x2.dtype)
        padded_tile = block_n * _round_up(C, sub) * _round_up(L, 128) * itemsize

    # VMEM budget: double-buffered x1/x2/out tiles + f32 conv temporaries +
    # headroom, capped below physical VMEM (room for Mosaic internal scratch).
    tmp_bytes = 16 * _round_up(block_n, 8) * _round_up(L, 128) * 4
    vmem_limit = 2 * 3 * padded_tile + tmp_bytes + (8 << 20)
    vmem_limit = int(min(max(vmem_limit, 16 << 20), vmem_cap - (16 << 20)))

    kernel = functools.partial(_sa_kernel, W, C, L)
    out = pl.pallas_call(
        kernel,
        out_shape=out_struct,
        grid=(grid_n,),
        in_specs=[
            pl.BlockSpec(memory_space=pltpu.MemorySpace.SMEM),    # folded conv weights
            pl.BlockSpec(memory_space=pltpu.MemorySpace.SMEM),    # folded BN shift
            pl.BlockSpec(blk, idx),                               # x1
            pl.BlockSpec(blk, idx),                               # x2
        ],
        out_specs=pl.BlockSpec(blk, idx),
        compiler_params=pltpu.CompilerParams(
            dimension_semantics=("parallel",),
            vmem_limit_bytes=vmem_limit),
    )(w_folded, shift, x1v, x2v)
    return out.reshape(N, C, H, W)


def sa_layer_ref(x1, x2, conv_w, bn_gamma, bn_beta, bn_mean, bn_var):
    """Pure-JAX reference (matches PyTorch eval-mode forward)."""
    ch_max = jnp.max(x1, axis=1, keepdims=True)
    ch_mean = jnp.mean(x2, axis=1, keepdims=True)
    xc = jnp.concatenate([ch_max, ch_mean], axis=1)
    conv = lax.conv_general_dilated(
        xc, conv_w, window_strides=(1, 1), padding=((1, 1), (1, 1)),
        dimension_numbers=("NCHW", "OIHW", "NCHW"))
    bn = (conv - bn_mean) * bn_gamma / jnp.sqrt(bn_var + BN_EPS) + bn_beta
    scale = jax.nn.sigmoid(bn)
    return x2 * scale


if __name__ == "__main__":
    key = jax.random.PRNGKey(0)
    k1, k2, k3 = jax.random.split(key, 3)

    N, C, H, W = 2, 4, 16, 16
    x1 = jax.random.normal(k1, (N, C, H, W), jnp.float32)
    x2 = jax.random.normal(k2, (N, C, H, W), jnp.float32)

    # Deterministic synthetic parameters (nn.Conv2d(2,1,3,bias=False) + BatchNorm2d(1)).
    conv_w = 0.2 * jax.random.normal(k3, (1, 2, 3, 3), jnp.float32)
    bn_gamma = jnp.float32(1.1)
    bn_beta = jnp.float32(0.05)
    bn_mean = jnp.float32(0.02)
    bn_var = jnp.float32(0.9)

    out = sa_layer(x1, x2, conv_w, bn_gamma, bn_beta, bn_mean, bn_var)
    out = jax.block_until_ready(out)

    ref = sa_layer_ref(x1, x2, conv_w, bn_gamma, bn_beta, bn_mean, bn_var)
    assert out.shape == (N, C, H, W)
    # Tolerance covers the approx (EUP) reciprocal in the sigmoid (~1e-4 rel err).
    assert np.allclose(np.asarray(out), np.asarray(ref), atol=5e-3, rtol=5e-3), \
        "Pallas kernel output does not match JAX reference"
    print("KERNEL_OK")
</pallas_src>

<mosaic_0001>
module attributes {stable_mosaic.version = 11 : i64} {
  func.func @_sa_kernel(%arg0: i32, %arg1: memref<18xf32, #tpu.memory_space<smem>>, %arg2: memref<1xf32, #tpu.memory_space<smem>>, %arg3: memref<2x1024xf32, #tpu.memory_space<vmem>>, %arg4: memref<2x1024xf32, #tpu.memory_space<vmem>>, %arg5: memref<2x1024xf32, #tpu.memory_space<vmem>>) attributes {dimension_semantics = [#tpu.dimension_semantics<parallel>], iteration_bounds = array<i64: 1>, scalar_prefetch = 0 : i64, scratch_operands = 0 : i64, tpu.core_type = #tpu.core_type<tc>, window_params = [{transform_indices = @transform_0, window_bounds = array<i64: 18>}, {transform_indices = @transform_1, window_bounds = array<i64: 1>}, {transform_indices = @transform_2, window_bounds = array<i64: 2, 1024>}, {transform_indices = @transform_3, window_bounds = array<i64: 2, 1024>}, {transform_indices = @transform_4, window_bounds = array<i64: 2, 1024>}]} {
    %c0 = arith.constant 0 : index
    %c0_0 = arith.constant 0 : index
    %0 = vector.load %arg3[%c0, %c0_0] : memref<2x1024xf32, #tpu.memory_space<vmem>>, vector<2x256xf32>
    %c0_1 = arith.constant 0 : index
    %c0_2 = arith.constant 0 : index
    %1 = vector.load %arg4[%c0_1, %c0_2] : memref<2x1024xf32, #tpu.memory_space<vmem>>, vector<2x256xf32>
    %c0_3 = arith.constant 0 : index
    %c256 = arith.constant 256 : index
    %2 = vector.load %arg3[%c0_3, %c256] : memref<2x1024xf32, #tpu.memory_space<vmem>>, vector<2x256xf32>
    %3 = arith.maximumf %0, %2 : vector<2x256xf32>
    %c0_4 = arith.constant 0 : index
    %c256_5 = arith.constant 256 : index
    %4 = vector.load %arg4[%c0_4, %c256_5] : memref<2x1024xf32, #tpu.memory_space<vmem>>, vector<2x256xf32>
    %5 = arith.addf %1, %4 : vector<2x256xf32>
    %c0_6 = arith.constant 0 : index
    %c512 = arith.constant 512 : index
    %6 = vector.load %arg3[%c0_6, %c512] : memref<2x1024xf32, #tpu.memory_space<vmem>>, vector<2x256xf32>
    %7 = arith.maximumf %3, %6 : vector<2x256xf32>
    %c0_7 = arith.constant 0 : index
    %c512_8 = arith.constant 512 : index
    %8 = vector.load %arg4[%c0_7, %c512_8] : memref<2x1024xf32, #tpu.memory_space<vmem>>, vector<2x256xf32>
    %9 = arith.addf %5, %8 : vector<2x256xf32>
    %c0_9 = arith.constant 0 : index
    %c768 = arith.constant 768 : index
    %10 = vector.load %arg3[%c0_9, %c768] : memref<2x1024xf32, #tpu.memory_space<vmem>>, vector<2x256xf32>
    %11 = arith.maximumf %7, %10 : vector<2x256xf32>
    %c0_10 = arith.constant 0 : index
    %c768_11 = arith.constant 768 : index
    %12 = vector.load %arg4[%c0_10, %c768_11] : memref<2x1024xf32, #tpu.memory_space<vmem>>, vector<2x256xf32>
    %13 = arith.addf %9, %12 : vector<2x256xf32>
    %cst = arith.constant 2.500000e-01 : f32
    %14 = vector.broadcast %cst : f32 to vector<2x256xf32>
    %15 = arith.mulf %13, %14 : vector<2x256xf32>
    %cst_12 = arith.constant 0.000000e+00 : f32
    %16 = vector.broadcast %cst_12 : f32 to vector<2x128xf32>
    %17 = tpu.concatenate %16, %11, %16 in 1 : vector<2x128xf32>, vector<2x256xf32>, vector<2x128xf32> -> vector<2x512xf32>
    %18 = tpu.concatenate %16, %15, %16 in 1 : vector<2x128xf32>, vector<2x256xf32>, vector<2x128xf32> -> vector<2x512xf32>
    %19 = tpu.iota {dimensions = array<i32: 1>} : vector<2x256xi32>
    %c16_i32 = arith.constant 16 : i32
    %c0_i32 = arith.constant 0 : i32
    %20 = arith.cmpi eq, %c16_i32, %c0_i32 : i32
    %c1_i32 = arith.constant 1 : i32
    %21 = arith.select %20, %c1_i32, %c16_i32 : i32
    %22 = vector.broadcast %21 : i32 to vector<2x256xi32>
    %23 = arith.remsi %19, %22 : vector<2x256xi32>
    %c0_i32_13 = arith.constant 0 : i32
    %24 = vector.broadcast %c0_i32_13 : i32 to vector<2x256xi32>
    %25 = arith.cmpi ne, %23, %24 : vector<2x256xi32>
    %c0_i32_14 = arith.constant 0 : i32
    %26 = vector.broadcast %c0_i32_14 : i32 to vector<2x256xi32>
    %27 = arith.cmpi slt, %23, %26 : vector<2x256xi32>
    %c0_i32_15 = arith.constant 0 : i32
    %28 = arith.cmpi slt, %21, %c0_i32_15 : i32
    %29 = vector.broadcast %28 : i1 to vector<2x256xi1>
    %30 = vector.broadcast %29 : vector<2x256xi1> to vector<2x256xi1>
    %31 = arith.xori %27, %30 : vector<2x256xi1>
    %32 = arith.andi %31, %25 : vector<2x256xi1>
    %33 = vector.broadcast %21 : i32 to vector<2x256xi32>
    %34 = arith.addi %23, %33 : vector<2x256xi32>
    %35 = arith.select %32, %34, %23 : vector<2x256xi1>, vector<2x256xi32>
    %c1_i32_16 = arith.constant 1 : i32
    %36 = vector.broadcast %c1_i32_16 : i32 to vector<2x256xi32>
    %37 = arith.cmpi sge, %35, %36 : vector<2x256xi32>
    %c14_i32 = arith.constant 14 : i32
    %38 = vector.broadcast %c14_i32 : i32 to vector<2x256xi32>
    %39 = arith.cmpi sle, %35, %38 : vector<2x256xi32>
    %c0_17 = arith.constant 0 : index
    %40 = memref.load %arg1[%c0_17] : memref<18xf32, #tpu.memory_space<smem>>
    %c1 = arith.constant 1 : index
    %41 = memref.load %arg1[%c1] : memref<18xf32, #tpu.memory_space<smem>>
    %c2 = arith.constant 2 : index
    %42 = memref.load %arg1[%c2] : memref<18xf32, #tpu.memory_space<smem>>
    %c3 = arith.constant 3 : index
    %43 = memref.load %arg1[%c3] : memref<18xf32, #tpu.memory_space<smem>>
    %c4 = arith.constant 4 : index
    %44 = memref.load %arg1[%c4] : memref<18xf32, #tpu.memory_space<smem>>
    %c5 = arith.constant 5 : index
    %45 = memref.load %arg1[%c5] : memref<18xf32, #tpu.memory_space<smem>>
    %c6 = arith.constant 6 : index
    %46 = memref.load %arg1[%c6] : memref<18xf32, #tpu.memory_space<smem>>
    %c7 = arith.constant 7 : index
    %47 = memref.load %arg1[%c7] : memref<18xf32, #tpu.memory_space<smem>>
    %c8 = arith.constant 8 : index
    %48 = memref.load %arg1[%c8] : memref<18xf32, #tpu.memory_space<smem>>
    %c9 = arith.constant 9 : index
    %49 = memref.load %arg1[%c9] : memref<18xf32, #tpu.memory_space<smem>>
    %c10 = arith.constant 10 : index
    %50 = memref.load %arg1[%c10] : memref<18xf32, #tpu.memory_space<smem>>
    %c11 = arith.constant 11 : index
    %51 = memref.load %arg1[%c11] : memref<18xf32, #tpu.memory_space<smem>>
    %c12 = arith.constant 12 : index
    %52 = memref.load %arg1[%c12] : memref<18xf32, #tpu.memory_space<smem>>
    %c13 = arith.constant 13 : index
    %53 = memref.load %arg1[%c13] : memref<18xf32, #tpu.memory_space<smem>>
    %c14 = arith.constant 14 : index
    %54 = memref.load %arg1[%c14] : memref<18xf32, #tpu.memory_space<smem>>
    %c15 = arith.constant 15 : index
    %55 = memref.load %arg1[%c15] : memref<18xf32, #tpu.memory_space<smem>>
    %c16 = arith.constant 16 : index
    %56 = memref.load %arg1[%c16] : memref<18xf32, #tpu.memory_space<smem>>
    %c17 = arith.constant 17 : index
    %57 = memref.load %arg1[%c17] : memref<18xf32, #tpu.memory_space<smem>>
    %cst_18 = arith.constant 0.000000e+00 : f32
    %58 = vector.broadcast %cst_18 : f32 to vector<2x256xf32>
    %cst_19 = arith.constant 0.000000e+00 : f32
    %59 = vector.broadcast %cst_19 : f32 to vector<2x256xf32>
    %60 = vector.extract_strided_slice %17 {offsets = [0, 111], sizes = [2, 256], strides = [1, 1]} : vector<2x512xf32> to vector<2x256xf32>
    %61 = vector.broadcast %40 : f32 to vector<2x256xf32>
    %62 = arith.mulf %61, %60 : vector<2x256xf32>
    %63 = arith.addf %59, %62 : vector<2x256xf32>
    %64 = vector.extract_strided_slice %18 {offsets = [0, 111], sizes = [2, 256], strides = [1, 1]} : vector<2x512xf32> to vector<2x256xf32>
    %65 = vector.broadcast %49 : f32 to vector<2x256xf32>
    %66 = arith.mulf %65, %64 : vector<2x256xf32>
    %67 = arith.addf %63, %66 : vector<2x256xf32>
    %68 = vector.extract_strided_slice %17 {offsets = [0, 127], sizes = [2, 256], strides = [1, 1]} : vector<2x512xf32> to vector<2x256xf32>
    %69 = vector.broadcast %43 : f32 to vector<2x256xf32>
    %70 = arith.mulf %69, %68 : vector<2x256xf32>
    %71 = arith.addf %67, %70 : vector<2x256xf32>
    %72 = vector.extract_strided_slice %18 {offsets = [0, 127], sizes = [2, 256], strides = [1, 1]} : vector<2x512xf32> to vector<2x256xf32>
    %73 = vector.broadcast %52 : f32 to vector<2x256xf32>
    %74 = arith.mulf %73, %72 : vector<2x256xf32>
    %75 = arith.addf %71, %74 : vector<2x256xf32>
    %76 = vector.extract_strided_slice %17 {offsets = [0, 143], sizes = [2, 256], strides = [1, 1]} : vector<2x512xf32> to vector<2x256xf32>
    %77 = vector.broadcast %46 : f32 to vector<2x256xf32>
    %78 = arith.mulf %77, %76 : vector<2x256xf32>
    %79 = arith.addf %75, %78 : vector<2x256xf32>
    %80 = vector.extract_strided_slice %18 {offsets = [0, 143], sizes = [2, 256], strides = [1, 1]} : vector<2x512xf32> to vector<2x256xf32>
    %81 = vector.broadcast %55 : f32 to vector<2x256xf32>
    %82 = arith.mulf %81, %80 : vector<2x256xf32>
    %83 = arith.addf %79, %82 : vector<2x256xf32>
    %cst_20 = arith.constant 0.000000e+00 : f32
    %84 = vector.broadcast %cst_20 : f32 to vector<2x256xf32>
    %85 = arith.select %37, %83, %84 : vector<2x256xi1>, vector<2x256xf32>
    %86 = arith.addf %58, %85 : vector<2x256xf32>
    %cst_21 = arith.constant 0.000000e+00 : f32
    %87 = vector.broadcast %cst_21 : f32 to vector<2x256xf32>
    %88 = vector.extract_strided_slice %17 {offsets = [0, 112], sizes = [2, 256], strides = [1, 1]} : vector<2x512xf32> to vector<2x256xf32>
    %89 = vector.broadcast %41 : f32 to vector<2x256xf32>
    %90 = arith.mulf %89, %88 : vector<2x256xf32>
    %91 = arith.addf %87, %90 : vector<2x256xf32>
    %92 = vector.extract_strided_slice %18 {offsets = [0, 112], sizes = [2, 256], strides = [1, 1]} : vector<2x512xf32> to vector<2x256xf32>
    %93 = vector.broadcast %50 : f32 to vector<2x256xf32>
    %94 = arith.mulf %93, %92 : vector<2x256xf32>
    %95 = arith.addf %91, %94 : vector<2x256xf32>
    %96 = vector.extract_strided_slice %17 {offsets = [0, 128], sizes = [2, 256], strides = [1, 1]} : vector<2x512xf32> to vector<2x256xf32>
    %97 = vector.broadcast %44 : f32 to vector<2x256xf32>
    %98 = arith.mulf %97, %96 : vector<2x256xf32>
    %99 = arith.addf %95, %98 : vector<2x256xf32>
    %100 = vector.extract_strided_slice %18 {offsets = [0, 128], sizes = [2, 256], strides = [1, 1]} : vector<2x512xf32> to vector<2x256xf32>
    %101 = vector.broadcast %53 : f32 to vector<2x256xf32>
    %102 = arith.mulf %101, %100 : vector<2x256xf32>
    %103 = arith.addf %99, %102 : vector<2x256xf32>
    %104 = vector.extract_strided_slice %17 {offsets = [0, 144], sizes = [2, 256], strides = [1, 1]} : vector<2x512xf32> to vector<2x256xf32>
    %105 = vector.broadcast %47 : f32 to vector<2x256xf32>
    %106 = arith.mulf %105, %104 : vector<2x256xf32>
    %107 = arith.addf %103, %106 : vector<2x256xf32>
    %108 = vector.extract_strided_slice %18 {offsets = [0, 144], sizes = [2, 256], strides = [1, 1]} : vector<2x512xf32> to vector<2x256xf32>
    %109 = vector.broadcast %56 : f32 to vector<2x256xf32>
    %110 = arith.mulf %109, %108 : vector<2x256xf32>
    %111 = arith.addf %107, %110 : vector<2x256xf32>
    %112 = arith.addf %86, %111 : vector<2x256xf32>
    %cst_22 = arith.constant 0.000000e+00 : f32
    %113 = vector.broadcast %cst_22 : f32 to vector<2x256xf32>
    %114 = vector.extract_strided_slice %17 {offsets = [0, 113], sizes = [2, 256], strides = [1, 1]} : vector<2x512xf32> to vector<2x256xf32>
    %115 = vector.broadcast %42 : f32 to vector<2x256xf32>
    %116 = arith.mulf %115, %114 : vector<2x256xf32>
    %117 = arith.addf %113, %116 : vector<2x256xf32>
    %118 = vector.extract_strided_slice %18 {offsets = [0, 113], sizes = [2, 256], strides = [1, 1]} : vector<2x512xf32> to vector<2x256xf32>
    %119 = vector.broadcast %51 : f32 to vector<2x256xf32>
    %120 = arith.mulf %119, %118 : vector<2x256xf32>
    %121 = arith.addf %117, %120 : vector<2x256xf32>
    %122 = vector.extract_strided_slice %17 {offsets = [0, 129], sizes = [2, 256], strides = [1, 1]} : vector<2x512xf32> to vector<2x256xf32>
    %123 = vector.broadcast %45 : f32 to vector<2x256xf32>
    %124 = arith.mulf %123, %122 : vector<2x256xf32>
    %125 = arith.addf %121, %124 : vector<2x256xf32>
    %126 = vector.extract_strided_slice %18 {offsets = [0, 129], sizes = [2, 256], strides = [1, 1]} : vector<2x512xf32> to vector<2x256xf32>
    %127 = vector.broadcast %54 : f32 to vector<2x256xf32>
    %128 = arith.mulf %127, %126 : vector<2x256xf32>
    %129 = arith.addf %125, %128 : vector<2x256xf32>
    %130 = vector.extract_strided_slice %17 {offsets = [0, 145], sizes = [2, 256], strides = [1, 1]} : vector<2x512xf32> to vector<2x256xf32>
    %131 = vector.broadcast %48 : f32 to vector<2x256xf32>
    %132 = arith.mulf %131, %130 : vector<2x256xf32>
    %133 = arith.addf %129, %132 : vector<2x256xf32>
    %134 = vector.extract_strided_slice %18 {offsets = [0, 145], sizes = [2, 256], strides = [1, 1]} : vector<2x512xf32> to vector<2x256xf32>
    %135 = vector.broadcast %57 : f32 to vector<2x256xf32>
    %136 = arith.mulf %135, %134 : vector<2x256xf32>
    %137 = arith.addf %133, %136 : vector<2x256xf32>
    %cst_23 = arith.constant 0.000000e+00 : f32
    %138 = vector.broadcast %cst_23 : f32 to vector<2x256xf32>
    %139 = arith.select %39, %137, %138 : vector<2x256xi1>, vector<2x256xf32>
    %140 = arith.addf %112, %139 : vector<2x256xf32>
    %c0_24 = arith.constant 0 : index
    %141 = memref.load %arg2[%c0_24] : memref<1xf32, #tpu.memory_space<smem>>
    %142 = vector.broadcast %141 : f32 to vector<2x256xf32>
    %143 = arith.addf %140, %142 : vector<2x256xf32>
    %cst_25 = arith.constant 0.000000e+00 : f32
    %144 = vector.broadcast %cst_25 : f32 to vector<2x256xf32>
    %145 = arith.subf %144, %143 : vector<2x256xf32>
    %146 = math.exp %145 : vector<2x256xf32>
    %cst_26 = arith.constant 1.000000e+00 : f32
    %147 = vector.broadcast %cst_26 : f32 to vector<2x256xf32>
    %148 = arith.addf %147, %146 : vector<2x256xf32>
    %149 = tpu.reciprocal %148 {approx = true} : vector<2x256xf32> -> vector<2x256xf32>
    %c0_27 = arith.constant 0 : index
    %c0_28 = arith.constant 0 : index
    %150 = vector.load %arg4[%c0_27, %c0_28] : memref<2x1024xf32, #tpu.memory_space<vmem>>, vector<2x256xf32>
    %151 = arith.mulf %150, %149 : vector<2x256xf32>
    %c0_29 = arith.constant 0 : index
    %c0_30 = arith.constant 0 : index
    %152 = vector.load %arg5[%c0_29, %c0_30] : memref<2x1024xf32, #tpu.memory_space<vmem>>, vector<2x256xf32>
    tpu.vector_store %arg5[%c0_29, %c0_30], %151 {strides = array<i32>} : memref<2x1024xf32, #tpu.memory_space<vmem>>, vector<2x256xf32>,
    %c0_31 = arith.constant 0 : index
    %c256_32 = arith.constant 256 : index
    %153 = vector.load %arg4[%c0_31, %c256_32] : memref<2x1024xf32, #tpu.memory_space<vmem>>, vector<2x256xf32>
    %154 = arith.mulf %153, %149 : vector<2x256xf32>
    %c0_33 = arith.constant 0 : index
    %c256_34 = arith.constant 256 : index
    %155 = vector.load %arg5[%c0_33, %c256_34] : memref<2x1024xf32, #tpu.memory_space<vmem>>, vector<2x256xf32>
    tpu.vector_store %arg5[%c0_33, %c256_34], %154 {strides = array<i32>} : memref<2x1024xf32, #tpu.memory_space<vmem>>, vector<2x256xf32>,
    %c0_35 = arith.constant 0 : index
    %c512_36 = arith.constant 512 : index
    %156 = vector.load %arg4[%c0_35, %c512_36] : memref<2x1024xf32, #tpu.memory_space<vmem>>, vector<2x256xf32>
    %157 = arith.mulf %156, %149 : vector<2x256xf32>
    %c0_37 = arith.constant 0 : index
    %c512_38 = arith.constant 512 : index
    %158 = vector.load %arg5[%c0_37, %c512_38] : memref<2x1024xf32, #tpu.memory_space<vmem>>, vector<2x256xf32>
    tpu.vector_store %arg5[%c0_37, %c512_38], %157 {strides = array<i32>} : memref<2x1024xf32, #tpu.memory_space<vmem>>, vector<2x256xf32>,
    %c0_39 = arith.constant 0 : index
    %c768_40 = arith.constant 768 : index
    %159 = vector.load %arg4[%c0_39, %c768_40] : memref<2x1024xf32, #tpu.memory_space<vmem>>, vector<2x256xf32>
    %160 = arith.mulf %159, %149 : vector<2x256xf32>
    %c0_41 = arith.constant 0 : index
    %c768_42 = arith.constant 768 : index
    %161 = vector.load %arg5[%c0_41, %c768_42] : memref<2x1024xf32, #tpu.memory_space<vmem>>, vector<2x256xf32>
    tpu.vector_store %arg5[%c0_41, %c768_42], %160 {strides = array<i32>} : memref<2x1024xf32, #tpu.memory_space<vmem>>, vector<2x256xf32>,
    return
  }
  func.func @transform_0(%arg0: i32) -> i32 {
    %c0_i32 = arith.constant 0 : i32
    %c0_i32_0 = arith.constant 0 : i32
    return %c0_i32 : i32
  }
  func.func @transform_1(%arg0: i32) -> i32 {
    %c0_i32 = arith.constant 0 : i32
    %c0_i32_0 = arith.constant 0 : i32
    return %c0_i32 : i32
  }
  func.func @transform_2(%arg0: i32) -> (i32, i32) {
    %c0_i32 = arith.constant 0 : i32
    %c0_i32_0 = arith.constant 0 : i32
    return %arg0, %c0_i32 : i32, i32
  }
  func.func @transform_3(%arg0: i32) -> (i32, i32) {
    %c0_i32 = arith.constant 0 : i32
    %c0_i32_0 = arith.constant 0 : i32
    return %arg0, %c0_i32 : i32, i32
  }
  func.func @transform_4(%arg0: i32) -> (i32, i32) {
    %c0_i32 = arith.constant 0 : i32
    %c0_i32_0 = arith.constant 0 : i32
    return %arg0, %c0_i32 : i32, i32
  }
}

</mosaic_0001>

<bundles_post_ra>
// kernel: tpu_custom_call.1
= control target key start
LH: loop header
LB: loop body
LE: loop exit
PB: predicated region body
PF: predicated region fallthrough
CT: control target
= control target key end

     0   :  { %10 = vsyncpa [#allocation6], 0  ;;  %s961_s0 = inlined_call_operand.vmem [shape: f32[18], index: 0, kind: input, shape index: {}]   ;;  %s962_s1 = inlined_call_operand.<no memory space> [shape: f32[1], index: 1, kind: input, shape index: {}]   ;;  %s963_s2 = inlined_call_operand.hbm [shape: f32[2,1024], index: 2, kind: input, shape index: {}]   ;;  %s964_s3 = inlined_call_operand.hbm [shape: f32[2,1024], index: 3, kind: input, shape index: {}]   ;;  %s965_s4 = inlined_call_operand.hbm [shape: f32[2,1024], index: 4, kind: output, shape index: {}]  }
   0x1   :  { %11 = vsyncpa [#allocation4], 0 }
   0x2   :  { %12 = vsyncpa [#allocation9], 0 }
   0x3   :  { %13 = vsyncpa [#allocation5], 0  ;;  %s20_s17 = sshll.u32 %s961_s0, 4  ;;  %s21_s17 = int_to_ptr.vmem [resolvable:$true] %s20_s17 }
   0x4   :  { %s568_s18 = scalar_lea.vmem %s21_s17, 16  ;;  %p573_p1 = scmp.lt.s32.totalorder %s21_s17, %s21_s17 }
   0x5   :  { %p569_p0 = scmp.ne.s32.totalorder %s21_s17, %s568_s18  ;;  %p574_p2 = scmp.lt.s32.totalorder %s568_s18, %s568_s18 }
   0x7   :  { %p575_p3 = por %p574_p2, %p573_p1 }
   0x9   :  { %p576_p4 = pnand %p575_p3, %p569_p0 }
   0xb   :  { %579 = shalt.err (!%p576_p4)
}
   0xc   :  { %s654_s19 = smov [#allocation3]   ;;  %s655_s20 = smov [#allocation7]  }
   0xd   :  { %23 = dma.vmem_to_smem %s21_s17, 16, %s654_s19, [#allocation6]  }
   0xe   :  { %s32_s21 = sshll.u32 %s655_s20, 4  ;;  %s656_s22 = smov [#allocation8]   ;;  %s33_s21 = int_to_ptr.vmem [resolvable:$true] %s32_s21 }
   0xf   :  { %s42_s23 = sshll.u32 %s656_s22, 4  ;;  %s580_s26 = scalar_lea.hbm %s963_s2, 256  ;;  %s43_s23 = int_to_ptr.vmem [resolvable:$true] %s42_s23 }
  0x10   :  { %p581_p5 = scmp.ne.s32.totalorder %s963_s2, %s580_s26  ;;  %p584_p6 = scmp.lt.u32.totalorder %s580_s26, %s963_s2 }
  0x12   :  { %p586_p7 = pnand %p584_p6, %p581_p5 }
  0x14   :  { %589 = shalt.err (!%p586_p7)
}
  0x15   :  { %s590_s30 = scalar_lea.vmem %s33_s21, 256  ;;  %p595_p9 = scmp.lt.s32.totalorder %s33_s21, %s33_s21 }
  0x16   :  { %p591_p8 = scmp.ne.s32.totalorder %s33_s21, %s590_s30  ;;  %p596_p10 = scmp.lt.s32.totalorder %s590_s30, %s590_s30 }
  0x18   :  { %p597_p11 = por %p596_p10, %p595_p9 }
  0x1a   :  { %p598_p12 = pnand %p597_p11, %p591_p8 }
  0x1c   :  { %601 = shalt.err (!%p598_p12)
}
  0x1d   :  { %35 = dma.hbm_to_vmem [thread:$0]  %s963_s2, 256, %s33_s21, [#allocation4]  }
  0x1e   :  { %s602_s9 = scalar_lea.hbm %s964_s3, 256 }
  0x1f   :  { %p603_p13 = scmp.ne.s32.totalorder %s964_s3, %s602_s9  ;;  %p606_p0 = scmp.lt.u32.totalorder %s602_s9, %s964_s3 }
  0x21   :  { %p608_p1 = pnand %p606_p0, %p603_p13 }
  0x23   :  { %611 = shalt.err (!%p608_p1)
}
  0x24   :  { %s612_s14 = scalar_lea.vmem %s43_s23, 256  ;;  %p617_p3 = scmp.lt.s32.totalorder %s43_s23, %s43_s23 }
  0x25   :  { %p613_p2 = scmp.ne.s32.totalorder %s43_s23, %s612_s14  ;;  %p618_p4 = scmp.lt.s32.totalorder %s612_s14, %s612_s14 }
  0x27   :  { %p619_p5 = por %p618_p4, %p617_p3 }
  0x29   :  { %p620_p6 = pnand %p619_p5, %p613_p2 }
  0x2b   :  { %623 = shalt.err (!%p620_p6)
}
  0x2c   :  { %45 = dma.hbm_to_vmem [thread:$0]  %s964_s3, 256, %s43_s23, [#allocation9]  }
  0x2d   :  { %646 = dma.done.wait [#allocation6], 16  }
  0x2e   :  { %647 = vsyncadd [#allocation6], 4294967280 }
  0x2f   :  { %648 = dma.done.wait [#allocation4], 256  }
  0x30   :  { %649 = vsyncadd [#allocation4], 4294967040 }
  0x31   :  { %650 = dma.done.wait [#allocation9], 256  }
  0x32   :  { %651 = vsyncadd [#allocation9], 4294967040 }
  0x33   :  { %55 = sfence }
  0x34   :  { %s544_s16 = sld [smem:[#allocation3 + $0xc]]  ;;  %v56_v0 = vld [vmem:[#allocation7] sm:$0xf]  ;;  %v75_v1 = vlaneseq  ;;  %s535_s17 = sld [smem:[#allocation3 + $0x3]]  ;;  %v58_v2 = vld [vmem:[#allocation7 + $0x4] sm:$0xf] }
  0x35   :  { %v62_v3 = vld [vmem:[#allocation7 + $0x8] sm:$0xf]  ;;  %v59_v4 = vmax.f32 %v56_v0, %v58_v2  ;;  %v66_v5 = vld [vmem:[#allocation7 + $0xc] sm:$0xf]  ;;  %v657_v7 = vmov 1983009808  }
  0x36   :  { %v76_v6 = vshrl.u32 %v75_v1, 7  ;;  %v73_v8 = vunpack.c.l.s4 %v657_v7  ;;  %s717_s3 = sld [smem:[#allocation3 + $0x4]]  ;;  %v719_v9 = vld [vmem:[#allocation8] sm:$0xf]  ;;  %v60_v10 = vld [vmem:[#allocation8 + $0x4] sm:$0xf] }
  0x37   :  { %v63_v11 = vmax.f32 %v59_v4, %v62_v3  ;;  %v61_v12 = vadd.f32 %v60_v10, %v719_v9  ;;  %v64_v13 = vld [vmem:[#allocation8 + $0x8] sm:$0xf]  ;;  %v68_v15 = vld [vmem:[#allocation8 + $0xc] sm:$0xf]  ;;  %s658_s18 = smov 112   ;;  %s537_s19 = sld [smem:[#allocation3 + $0x5]] }
  0x38   :  { %v74_v14 = vunpack.c.0.s8 %v73_v8  ;;  %s741_s20 = sld [smem:[#allocation3 + $0xd]]  ;;  %s533_s21 = sld [smem:[#allocation3 + $0x1]]  ;;  %vm169_vm0 = vcmask 916480   ;;  %vm212_vm1 = vcmask 785408   ;;  %vm251_vm2 = vcmask 138240  }
  0x39   :  { %v67_v17 = vmax.f32 %v63_v11, %v66_v5  ;;  %v65_v18 = vadd.f32 %v64_v13, %v61_v12  ;;  %s124_s22 = sld [smem:[#allocation3]]  ;;  %s541_s23 = sld [smem:[#allocation3 + $0x9]]  ;;  %vm471_vm3 = vcmask 121856   ;;  %vm357_vm5 = vcmask 130048  }
  0x3a   :  { %v178_v16 = vstv %s544_s16  ;;  %v156_v20 = vstv %s535_s17  ;;  %v722_v21 = vsub.s32 %v74_v14, %v76_v6  ;;  %s542_s24 = sld [smem:[#allocation3 + $0xa]]  ;;  %s538_s25 = sld [smem:[#allocation3 + $0x6]] }
  0x3b   :  { %v179_v19 = vmul.f32 0.0, %v178_v16  ;;  %v157_v22 = vmul.f32 0.0, %v156_v20  ;;  %v69_v23 = vadd.f32 %v68_v15, %v65_v18  ;;  %s534_s26 = sld [smem:[#allocation3 + $0x2]]  ;;  %s543_s0 = sld [smem:[#allocation3 + $0xb]] }
  0x3c   :  { %v726_v24 = vrot.slane %v67_v17, %v722_v21  ;;  %v274_v25 = vstv %s717_s3  ;;  %s546_s27 = sld [smem:[#allocation3 + $0xe]]  ;;  %s539_s28 = sld [smem:[#allocation3 + $0x7]] }
  0x3d   :  { %185 = vrot.lane.b32.xlu1 %v179_v19, %s658_s18  ;;  %163 = vrot.lane.b32.xlu0 %v157_v22, %s658_s18  ;;  %v70_v26 = vmul.f32 0.25, %v69_v23  ;;  %v378_v36 = vstv %s537_s19  ;;  %s659_s29 = smov 96   ;;  %s547_s30 = sld [smem:[#allocation3 + $0xf]] }
  0x3e   :  { %v275_v27 = vmul.f32 %v274_v25, %v726_v24  ;;  %v158_v28 = vmul.f32 %v156_v20, %v726_v24  ;;  %v734_v29 = vcombine.high %v726_v24, %v726_v24  ;;  %v290_v38 = vstv %s741_s20  ;;  %s540_s5 = sld [smem:[#allocation3 + $0x8]]  ;;  %s549_s7 = sld [smem:[#allocation3 + $0x11]] }
  0x3f   :  { %v737_v30 = vrot.slane %v70_v26, %v722_v21  ;;  %v379_v39 = vmul.f32 %v378_v36, %v726_v24  ;;  %v758_v40 = vstv %s533_s21  ;;  %v760_v41 = vstv %s124_s22  ;;  %s548_s6 = sld [smem:[#allocation3 + $0x10]]  ;;  %s660_s8 = smov 16  }
  0x40   :  { %v159_v31 = vmul.f32 %v156_v20, %v734_v29  ;;  %v276_v32 = vmul.f32 %v274_v25, %v734_v29  ;;  %v380_v37 = vmul.f32 %v378_v36, %v734_v29  ;;  %v762_v42 = vstv %s541_s23  ;;  %s661_s9 = smov 15   ;;  %s662_s10 = smov 17  }
  0x41   :  { %279 = vrot.lane.b32.xlu1 %v275_v27, %s658_s18  ;;  %165 = vrot.lane.b32.xlu0 %v158_v28, %s658_s18  ;;  %v747_v33 = vcombine.high %v737_v30, %v737_v30  ;;  %v180_v35 = vmul.f32 %v178_v16, %v737_v30  ;;  %v381_v43 = vmul.f32 0.0, %v378_v36  ;;  %v764_v44 = vstv %s542_s24 }
  0x42   :  { %v262_v45 = vmul.f32 %v758_v40, %v726_v24  ;;  %v269_v46 = vmul.f32 %v764_v44, %v737_v30  ;;  %v263_v48 = vmul.f32 %v758_v40, %v734_v29  ;;  %v144_v49 = vmul.f32 %v760_v41, %v726_v24 }
  0x43   :  { %v181_v34 = vmul.f32 %v178_v16, %v747_v33  ;;  %v270_v47 = vmul.f32 %v764_v44, %v747_v33  ;;  %v291_v50 = vmul.f32 %v290_v38, %v737_v30  ;;  %v199_v51 = vstv %s538_s25 }
  0x44   :  { %v151_v52 = vmul.f32 %v762_v42, %v737_v30  ;;  %v152_v53 = vmul.f32 %v762_v42, %v747_v33  ;;  %v783_v54 = vadd.f32 %v269_v46, %v262_v45  ;;  %v145_v56 = vmul.f32 %v760_v41, %v734_v29 }
  0x45   :  { %167 = vrot.lane.b32.xlu1 %v159_v31, %s658_s18  ;;  %281 = vrot.lane.b32.xlu0 %v276_v32, %s658_s18  ;;  %v785_v55 = vadd.f32 %v270_v47, %v263_v48  ;;  %v789_v57 = vstv %s534_s26  ;;  %v793_v59 = vstv %s543_s0  ;;  %v200_v0 = vmul.f32 %v199_v51, %v726_v24 }
  0x46   :  { %v791_v58 = vadd.f32 %v151_v52, %v144_v49  ;;  %v366_v60 = vmul.f32 %v789_v57, %v726_v24  ;;  %v797_v61 = vadd.f32 %v152_v53, %v145_v56  ;;  %v373_v62 = vmul.f32 %v793_v59, %v737_v30 }
  0x47   :  { %v367_v63 = vmul.f32 %v789_v57, %v734_v29  ;;  %v374_v2 = vmul.f32 %v793_v59, %v747_v33  ;;  %v292_v3 = vmul.f32 %v290_v38, %v747_v33  ;;  %v202_v6 = vmul.f32 0.0, %v199_v51 }
  0x48   :  { %v809_v4 = vadd.f32 %v373_v62, %v366_v60  ;;  %v201_v7 = vmul.f32 %v199_v51, %v734_v29  ;;  %v399_v8 = vstv %s546_s27  ;;  %v306_v12 = vstv %s539_s28 }
  0x49   :  { %189 = vrot.lane.b32.xlu1 %v181_v34, %s658_s18  ;;  %187 = vrot.lane.b32.xlu0 %v180_v35, %s658_s18  ;;  %v811_v5 = vadd.f32 %v374_v2, %v367_v63  ;;  %v401_v10 = vmul.f32 %v399_v8, %v747_v33  ;;  %v400_v11 = vmul.f32 %v399_v8, %v737_v30  ;;  %v402_v14 = vmul.f32 0.0, %v399_v8 }
  0x4a   :  { %v307_v13 = vmul.f32 %v306_v12, %v726_v24  ;;  %v309_v15 = vmul.f32 0.0, %v306_v12  ;;  %v308_v16 = vmul.f32 %v306_v12, %v734_v29  ;;  %v221_v17 = vstv %s547_s30 }
  0x4b   :  { %v223_v18 = vmul.f32 %v221_v17, %v747_v33  ;;  %v222_v19 = vmul.f32 %v221_v17, %v737_v30  ;;  %v420_v20 = vstv %s540_s5  ;;  %v224_v23 = vmul.f32 0.0, %v221_v17 }
  0x4c   :  { %v421_v22 = vmul.f32 %v420_v20, %v726_v24  ;;  %v423_v25 = vmul.f32 0.0, %v420_v20  ;;  %v422_v26 = vmul.f32 %v420_v20, %v734_v29  ;;  %v327_v27 = vstv %s548_s6 }
  0x4d   :  { %387 = vrot.lane.b32.xlu1 %v380_v37, %s658_s18  ;;  %385 = vrot.lane.b32.xlu0 %v379_v39, %s658_s18  ;;  %v329_v28 = vmul.f32 %v327_v27, %v747_v33  ;;  %v328_v24 = vmul.f32 %v327_v27, %v737_v30  ;;  %v441_v31 = vstv %s549_s7  ;;  %v330_v34 = vmul.f32 0.0, %v327_v27 }
  0x4e   :  { %v442_v32 = vmul.f32 %v441_v31, %v737_v30  ;;  %v444_v29 = vmul.f32 0.0, %v441_v31  ;;  %v443_v35 = vmul.f32 %v441_v31, %v747_v33 }
  0x51   :  { %295 = vrot.lane.b32.xlu1 %v291_v50, %s658_s18  ;;  %389 = vrot.lane.b32.xlu0 %v381_v43, %s658_s18 }
  0x55   :  { %206 = vrot.lane.b32.xlu1 %v200_v0, %s659_s29  ;;  %297 = vrot.lane.b32.xlu0 %v292_v3, %s658_s18  ;;  %v261_v3 = vmul.f32 0.0, %v758_v40 }
  0x59   :  { %210 = vrot.lane.b32.xlu1 %v202_v6, %s659_s29  ;;  %208 = vrot.lane.b32.xlu0 %v201_v7, %s659_s29  ;;  %v268_v6 = vmul.f32 0.0, %v764_v44 }
  0x5b   :  { %v271_v12 = vadd.f32 %v268_v6, %v261_v3 }
  0x5d   :  { %408 = vrot.lane.b32.xlu1 %v401_v10, %s658_s18  ;;  %406 = vrot.lane.b32.xlu0 %v400_v11, %s658_s18  ;;  %v365_v10 = vmul.f32 0.0, %v789_v57  ;;  %v372_v11 = vmul.f32 0.0, %v793_v59 }
  0x5f   :  { %v375_v17 = vadd.f32 %v372_v11, %v365_v10 }
  0x61   :  { %313 = vrot.lane.b32.xlu1 %v307_v13, %s659_s29  ;;  %410 = vrot.lane.b32.xlu0 %v402_v14, %s658_s18 }
  0x65   :  { %317 = vrot.lane.b32.xlu1 %v309_v15, %s659_s29  ;;  %315 = vrot.lane.b32.xlu0 %v308_v16, %s659_s29  ;;  %v143_v15 = vmul.f32 0.0, %v760_v41  ;;  %v150_v16 = vmul.f32 0.0, %v762_v42 }
  0x67   :  { %v153_v57 = vadd.f32 %v150_v16, %v143_v15 }
  0x69   :  { %230 = vrot.lane.b32.xlu1 %v223_v18, %s659_s29  ;;  %228 = vrot.lane.b32.xlu0 %v222_v19, %s659_s29 }
  0x6d   :  { %427 = vrot.lane.b32.xlu1 %v421_v22, %s659_s29  ;;  %232 = vrot.lane.b32.xlu0 %v224_v23, %s659_s29 }
  0x71   :  { %431 = vrot.lane.b32.xlu1 %v423_v25, %s659_s29  ;;  %429 = vrot.lane.b32.xlu0 %v422_v26, %s659_s29 }
  0x75   :  { %336 = vrot.lane.b32.xlu1 %v329_v28, %s659_s29  ;;  %334 = vrot.lane.b32.xlu0 %v328_v24, %s659_s29 }
  0x79   :  { %448 = vrot.lane.b32.xlu1 %v442_v32, %s659_s29  ;;  %338 = vrot.lane.b32.xlu0 %v330_v34, %s659_s29 }
  0x7d   :  { %452 = vrot.lane.b32.xlu1 %v444_v29, %s659_s29  ;;  %450 = vrot.lane.b32.xlu0 %v443_v35, %s659_s29 }
  0xaf   :  { %v186_v36 = vpop.permute.xlu1 %185  ;;  %v164_v37 = vpop.permute.xlu0 %163 }
  0xb3   :  { %v848_v38 = vpop.permute.xlu1 %279  ;;  %v166_v39 = vpop.permute.xlu0 %165 }
  0xb4   :  { %v287_v18 = vadd.f32 %v848_v38, %v271_v12  ;;  %v170_v59 = vsel %vm169_vm0, %v164_v37, %v166_v39 }
  0xb5   :  { %v175_v31 = vadd.f32 %v170_v59, %v153_v57 }
  0xb7   :  { %v850_v30 = vpop.permute.xlu1 %167  ;;  %v852_v43 = vpop.permute.xlu0 %281 }
  0xb8   :  { %v289_v41 = vadd.f32 %v852_v43, %v785_v55  ;;  %v171_v26 = vsel %vm169_vm0, %v166_v39, %v850_v30 }
  0xb9   :  { %v176_v35 = vadd.f32 %v171_v26, %v791_v58  ;;  %v283_v58 = vsel %vm169_vm0, %v848_v38, %v852_v43 }
  0xbb   :  { %v854_v45 = vpop.permute.xlu1 %189  ;;  %v188_v46 = vpop.permute.xlu0 %187 }
  0xbc   :  { %v191_v27 = vsel %vm169_vm0, %v186_v36, %v188_v46  ;;  %v192_v29 = vsel %vm169_vm0, %v188_v46, %v854_v45  ;;  %v177_v46 = vadd.f32 %v850_v30, %v797_v61 }
  0xbd   :  { %v196_v37 = vadd.f32 %v191_v27, %v175_v31  ;;  %v197_v11 = vadd.f32 %v192_v29, %v176_v35 }
  0xbf   :  { %v856_v47 = vpop.permute.xlu1 %387  ;;  %v386_v48 = vpop.permute.xlu0 %385 }
  0xc0   :  { %v396_v20 = vadd.f32 %v386_v48, %v375_v17 }
  0xc3   :  { %v858_v33 = vpop.permute.xlu1 %295  ;;  %v860_v49 = vpop.permute.xlu0 %389 }
  0xc4   :  { %v303_v44 = vadd.f32 %v858_v33, %v287_v18  ;;  %v198_v18 = vadd.f32 %v854_v45, %v177_v46 }
  0xc7   :  { %v207_v50 = vpop.permute.xlu1 %206  ;;  %v862_v51 = vpop.permute.xlu0 %297 }
  0xc8   :  { %v305_v32 = vadd.f32 %v862_v51, %v289_v41  ;;  %v218_v12 = vadd.f32 %v207_v50, %v196_v37  ;;  %v299_v38 = vsel %vm169_vm0, %v858_v33, %v862_v51 }
  0xcb   :  { %v211_v52 = vpop.permute.xlu1 %210  ;;  %v209_v53 = vpop.permute.xlu0 %208 }
  0xcc   :  { %v213_v6 = vsel %vm212_vm1, %v207_v50, %v209_v53  ;;  %v214_v16 = vsel %vm212_vm1, %v209_v53, %v211_v52  ;;  %v288_v53 = vadd.f32 %v283_v58, %v783_v54 }
  0xcd   :  { %v219_v30 = vadd.f32 %v213_v6, %v197_v11 }
  0xcf   :  { %v864_v56 = vpop.permute.xlu1 %408  ;;  %v407_v60 = vpop.permute.xlu0 %406 }
  0xd0   :  { %v417_v42 = vadd.f32 %v407_v60, %v396_v20 }
  0xd3   :  { %v866_v62 = vpop.permute.xlu1 %313  ;;  %v868_v63 = vpop.permute.xlu0 %410 }
  0xd4   :  { %v324_v22 = vadd.f32 %v866_v62, %v303_v44  ;;  %v413_v54 = vsel %vm169_vm0, %v864_v56, %v868_v63 }
  0xd7   :  { %v318_v0 = vpop.permute.xlu1 %317  ;;  %v870_v2 = vpop.permute.xlu0 %315 }
  0xd8   :  { %v320_v28 = vsel %vm212_vm1, %v870_v2, %v318_v0  ;;  %v391_v0 = vsel %vm169_vm0, %v386_v48, %v856_v47  ;;  %v412_v48 = vsel %vm169_vm0, %v407_v60, %v864_v56  ;;  %v220_v60 = vadd.f32 %v214_v16, %v198_v18 }
  0xd9   :  { %v326_v39 = vadd.f32 %v320_v28, %v305_v32  ;;  %v397_v61 = vadd.f32 %v391_v0, %v809_v4  ;;  %v392_v4 = vsel %vm169_vm0, %v856_v47, %v860_v49  ;;  %v319_v33 = vsel %vm212_vm1, %v866_v62, %v870_v2 }
  0xda   :  { %v398_v20 = vadd.f32 %v392_v4, %v811_v5 }
  0xdb   :  { %v231_v7 = vpop.permute.xlu1 %230  ;;  %v229_v8 = vpop.permute.xlu0 %228  ;;  %v418_v45 = vadd.f32 %v412_v48, %v397_v61 }
  0xdc   :  { %v234_v17 = vsel %vm212_vm1, %v229_v8, %v231_v7  ;;  %v239_v50 = vadd.f32 %v229_v8, %v218_v12  ;;  %v419_v2 = vadd.f32 %v413_v54, %v398_v20 }
  0xdd   :  { %v240_v57 = vadd.f32 %v234_v17, %v219_v30 }
  0xdf   :  { %v428_v13 = vpop.permute.xlu1 %427  ;;  %v233_v14 = vpop.permute.xlu0 %232 }
  0xe0   :  { %v438_v34 = vadd.f32 %v428_v13, %v417_v42  ;;  %v235_v43 = vsel %vm212_vm1, %v231_v7, %v233_v14  ;;  %v304_v7 = vadd.f32 %v299_v38, %v288_v53 }
  0xe1   :  { %v241_v8 = vadd.f32 %v235_v43, %v220_v60  ;;  %v507_v60 = vld [vmem:[#allocation8 + $0x4] sm:$0xf] }
  0xe2   :  { %v325_v59 = vadd.f32 %v319_v33, %v304_v7 }
  0xe3   :  { %v879_v19 = vpop.permute.xlu1 %431  ;;  %v881_v40 = vpop.permute.xlu0 %429 }
  0xe4   :  { %v433_v52 = vsel %vm212_vm1, %v428_v13, %v881_v40  ;;  %v434_v62 = vsel %vm212_vm1, %v881_v40, %v879_v19 }
  0xe5   :  { %v439_v13 = vadd.f32 %v433_v52, %v418_v45  ;;  %v440_v42 = vadd.f32 %v434_v62, %v419_v2  ;;  %v510_v45 = vld [vmem:[#allocation8 + $0x8] sm:$0xf] }
  0xe7   :  { %v337_v23 = vpop.permute.xlu1 %336  ;;  %v335_v25 = vpop.permute.xlu0 %334 }
  0xe8   :  { %v345_v24 = vadd.f32 %v335_v25, %v324_v22  ;;  %v340_v14 = vsel %vm212_vm1, %v335_v25, %v337_v23 }
  0xe9   :  { %v346_v22 = vadd.f32 %v340_v14, %v325_v59 }
  0xea   :  { %351 = vrot.lane.b32.xlu1 %v345_v24, %s660_s8 }
  0xeb   :  { %v449_v55 = vpop.permute.xlu1 %448  ;;  %v339_v36 = vpop.permute.xlu0 %338 }
  0xec   :  { %v459_v3 = vadd.f32 %v449_v55, %v438_v34  ;;  %v341_v10 = vsel %vm212_vm1, %v337_v23, %v339_v36  ;;  %v94_v23 = vand.u32 127, %v75_v1 }
  0xed   :  { %v347_v15 = vadd.f32 %v341_v10, %v326_v39 }
  0xee   :  { %465 = vrot.lane.b32.xlu0 %v459_v3, %s661_s9  ;;  %v95_v27 = vadd.s32 128, %v94_v23  ;;  %v100_v19 = vand.u32 15, %v94_v23  ;;  %v481_v3 = vstv %s962_s1  ;;  %s663_s1 = smov [#allocation10]  }
  0xef   :  { %v451_v44 = vpop.permute.xlu0 %450  ;;  %355 = vrot.lane.b32.xlu1 %v347_v15, %s660_s8  ;;  %v453_v49 = vpop.permute.xlu1 %452  ;;  %s522_s13 = sshll.u32 %s663_s1, 4  ;;  %s523_s13 = int_to_ptr.vmem [resolvable:$true] %s522_s13 }
  0xf0   :  { %v454_v51 = vsel %vm212_vm1, %v449_v55, %v451_v44  ;;  %v455_v41 = vsel %vm212_vm1, %v451_v44, %v453_v49  ;;  %v107_v24 = vand.u32 15, %v95_v27  ;;  %vm120_vm4 = vcmp.ge.s32.totalorder %v100_v19, 1  ;;  %s624_s14 = scalar_lea.vmem %s523_s13, 256  ;;  %p629_p8 = scmp.lt.s32.totalorder %s523_s13, %s523_s13 }
  0xf1   :  { %v460_v47 = vadd.f32 %v454_v51, %v439_v13  ;;  %v461_v56 = vadd.f32 %v455_v41, %v440_v42  ;;  %vm122_vm6 = vcmp.le.s32.totalorder %v100_v19, 14  ;;  %p625_p7 = scmp.ne.s32.totalorder %s523_s13, %s624_s14  ;;  %p630_p9 = scmp.lt.s32.totalorder %s624_s14, %s624_s14 }
  0xf2   :  { %245 = vrot.lane.b32.xlu0 %v239_v50, %s662_s10  ;;  %vm121_vm7 = vcmp.ge.s32.totalorder %v107_v24, 1  ;;  %vm123_vm8 = vcmp.le.s32.totalorder %v107_v24, 14 }
  0xf3   :  { %247 = vrot.lane.b32.xlu1 %v240_v57, %s662_s10  ;;  %v513_v57 = vld [vmem:[#allocation8 + $0xc] sm:$0xf]  ;;  %p631_p10 = por %p630_p9, %p629_p8 }
  0xf5   :  { %p632_p11 = pnand %p631_p10, %p625_p7 }
  0xf6   :  { %249 = vrot.lane.b32.xlu0 %v241_v8, %s662_s10 }
  0xf7   :  { %467 = vrot.lane.b32.xlu1 %v460_v47, %s661_s9 }
  0xfa   :  { %353 = vrot.lane.b32.xlu0 %v346_v22, %s660_s8 }
  0xfe   :  { %469 = vrot.lane.b32.xlu0 %v461_v56, %s661_s9 }
 0x15c   :  { %v352_v5 = vpop.permute.xlu1 %351 }
 0x160   :  { %v466_v63 = vpop.permute.xlu0 %465 }
 0x161   :  { %v356_v25 = vpop.permute.xlu1 %355 }
 0x164   :  { %v246_v26 = vpop.permute.xlu0 %245 }
 0x165   :  { %v248_v40 = vpop.permute.xlu1 %247 }
 0x166   :  { %v252_v31 = vsel %vm251_vm2, %v246_v26, %v248_v40 }
 0x167   :  { %v256_v55 = vsel %vm120_vm4, %v252_v31, 0.0 }
 0x168   :  { %v250_v28 = vpop.permute.xlu0 %249 }
 0x169   :  { %v468_v32 = vpop.permute.xlu1 %467  ;;  %v253_v1 = vsel %vm251_vm2, %v248_v40, %v250_v28 }
 0x16a   :  { %v472_v34 = vsel %vm471_vm3, %v466_v63, %v468_v32  ;;  %v257_v0 = vsel %vm121_vm7, %v253_v1, 0.0 }
 0x16b   :  { %v476_v36 = vsel %vm122_vm6, %v472_v34, 0.0 }
 0x16c   :  { %v354_v29 = vpop.permute.xlu0 %353 }
 0x16d   :  { %v358_v35 = vsel %vm357_vm5, %v352_v5, %v354_v29  ;;  %v359_v37 = vsel %vm357_vm5, %v354_v29, %v356_v25 }
 0x16e   :  { %v362_v39 = vadd.f32 %v358_v35, %v256_v55  ;;  %v363_v46 = vadd.f32 %v359_v37, %v257_v0 }
 0x170   :  { %v478_v6 = vadd.f32 %v476_v36, %v362_v39  ;;  %v470_v10 = vpop.permute.xlu0 %469 }
 0x171   :  { %v473_v11 = vsel %vm471_vm3, %v468_v32, %v470_v10 }
 0x172   :  { %v482_v12 = vadd.f32 %v481_v3, %v478_v6  ;;  %v477_v15 = vsel %vm123_vm8, %v473_v11, 0.0 }
 0x173   :  { %v479_v58 = vadd.f32 %v477_v15, %v363_v46 }
 0x174   :  { %v484_v16 = vsub.f32 0.0, %v482_v12 }
 0x175   :  { %v483_v48 = vadd.f32 %v481_v3, %v479_v58 }
 0x176   :  { %v486_v17 = vmul.f32 1.442695, %v484_v16 }
 0x177   :  { %v485_v18 = vsub.f32 0.0, %v483_v48 }
 0x178   :  { %560 = vpow2.f32 %v486_v17 }
 0x179   :  { %v488_v61 = vmul.f32 1.442695, %v485_v18 }
 0x17b   :  { %562 = vpow2.f32 %v488_v61 }
 0x182   :  { %v561_v30 = vpop.eup %560 }
 0x183   :  { %v490_v50 = vadd.f32 1.0, %v561_v30 }
 0x185   :  { %v563_v44 = vpop.eup %562  ;;  %564 = vrcp.f32 %v490_v50 }
 0x186   :  { %v491_v38 = vadd.f32 1.0, %v563_v44 }
 0x188   :  { %566 = vrcp.f32 %v491_v38 }
 0x18f   :  { %v565_v43 = vpop.eup %564 }
 0x192   :  { %v567_v52 = vpop.eup %566 }
 0x193   :  { %v496_v53 = vcombine.low %v565_v43, %v567_v52 }
 0x195   :  { %v503_v4 = vrot.slane %v496_v53, %v722_v21 }
 0x197   :  { %v505_v33 = vmul.f32 %v503_v4, %v719_v9  ;;  %v508_v51 = vmul.f32 %v507_v60, %v503_v4  ;;  %v511_v7 = vmul.f32 %v510_v45, %v503_v4  ;;  %v514_v8 = vmul.f32 %v513_v57, %v503_v4 }
 0x199   :  { %506 = vst [vmem:[#allocation10] sm:$0xf] %v505_v33  ;;  %509 = vst [vmem:[#allocation10 + $0x4] sm:$0xf] %v508_v51 }
 0x19a   :  { %512 = vst [vmem:[#allocation10 + $0x8] sm:$0xf] %v511_v7  ;;  %515 = vst [vmem:[#allocation10 + $0xc] sm:$0xf] %v514_v8 }
 0x19b   :  { %635 = shalt.err (!%p632_p11)
}
 0x19c   :  { %s636_s16 = scalar_lea.hbm %s965_s4, 256 }
 0x19d   :  { %p637_p12 = scmp.ne.s32.totalorder %s965_s4, %s636_s16  ;;  %p640_p13 = scmp.lt.u32.totalorder %s636_s16, %s965_s4 }
 0x19f   :  { %p642_p0 = pnand %p640_p13, %p637_p12 }
 0x1a1   :  { %645 = shalt.err (!%p642_p0)
}
 0x1a2   :  { %525 = dma.vmem_to_hbm [thread:$0]  %s523_s13, 256, %s965_s4, [#allocation5]  }
 0x1a3   :  { %652 = dma.done.wait [#allocation5], 256  }
 0x1a4   :  { %653 = vsyncadd [#allocation5], 4294967040 }
 0x1a5   :  { %529 = vsyncpa [#allocation4], 1 }
 0x1a6   :  { %530 = vsyncpa [#allocation9], 1 }
 0x1a7   :  { %531 = vsyncpa [#allocation5], 1 }
 0x1a8   :  { %532 = vsyncpa [#allocation6], 1 }

</bundles_post_ra>
